<compile_context>
chip_gen: v7x
topology: tpu7x:2x2x1
jax: 0.10.0
libtpu: 0.0.40
codegen_flags: <defaults>
</compile_context>

<pallas_src>
import functools

import jax
import jax.numpy as jnp
from jax.experimental import pallas as pl
from jax.experimental.pallas import tpu as pltpu


# ---------------------------------------------------------------------------
# Fused Pallas kernel: the entire Encoder1d forward for B batch elements
# ---------------------------------------------------------------------------
def _encoder1d_kernel(xf_ref, w1_ref, w2_ref, w3_ref, rw3_ref, rw1_ref, bias_ref,
                      o_ref, *, n_res_layers):
    f32 = jnp.float32
    cdt = w1_ref.dtype                       # matmul operand dtype (bf16 or f32)

    B, H, L2 = o_ref.shape                   # (batch tile, h_dim, L // 4)
    M = B * L2                               # rows stacked into the matmul M dim
    H1 = w1_ref.shape[1]                     # h_dim // 2
    C4 = xf_ref.shape[2]                     # 4 * in_dim (folded input channels)
    twoC = C4 // 2

    bias = bias_ref[...].astype(f32)         # (3, H): row0 = b1 (first H1 lanes), b2, b3

    # Per-batch boundary masks for the row-shift helpers (batch elements are stacked
    # along the row axis, so a plain +-1 row shift would leak across batch borders).
    if B > 1:
        row = jax.lax.broadcasted_iota(jnp.int32, (M, 1), 0)
        keep_prev = (row % L2) != 0
        keep_next = (row % L2) != (L2 - 1)
    else:
        keep_prev = keep_next = None

    def shift_prev(v):                       # row r -> v[r-1]; first row of a batch -> 0
        z = jnp.zeros((1, v.shape[1]), v.dtype)
        s = jnp.concatenate([z, v[:M - 1]], axis=0)
        return jnp.where(keep_prev, s, 0.0) if B > 1 else s

    def shift_next(v):                       # row r -> v[r+1]; last row of a batch -> 0
        z = jnp.zeros((1, v.shape[1]), v.dtype)
        s = jnp.concatenate([v[1:], z], axis=0)
        return jnp.where(keep_next, s, 0.0) if B > 1 else s

    # ---- conv1: k=4, s=2, p=1 (+ ReLU) --------------------------------------
    # Folded input row j holds x_pad[4j .. 4j+3]; even outputs read folded row j,
    # odd outputs read [2nd half of row j | 1st half of row j+1].  Both phases are
    # stacked into one (2M, 4*C_in) matmul against the tap-major w1.
    xf = xf_ref[...]                                             # (B, L2+1, 4*C_in)
    even = xf[:, :L2, :].reshape(M, C4)
    odd = jnp.concatenate([xf[:, :L2, twoC:], xf[:, 1:, :twoC]], axis=-1).reshape(M, C4)
    x1 = jnp.concatenate([even, odd], axis=0)                    # (2M, 4*C_in)
    a = jnp.dot(x1, w1_ref[...], preferred_element_type=f32) + bias[0:1, :H1]
    a = jnp.maximum(a, 0.0).astype(cdt)                          # cast ONCE, before taps
    a_even, a_odd = a[:M], a[M:]                                 # a[0::2], a[1::2]

    # ---- conv2: k=4, s=2, p=1 (+ ReLU) --------------------------------------
    # out[m] taps: a[2m-1], a[2m], a[2m+1], a[2m+2]  ==  shifted parity halves.
    w2 = w2_ref[...]                                             # (4, H1, H) tap-major
    b_act = (jnp.dot(shift_prev(a_odd), w2[0], preferred_element_type=f32)
             + jnp.dot(a_even, w2[1], preferred_element_type=f32)
             + jnp.dot(a_odd, w2[2], preferred_element_type=f32)
             + jnp.dot(shift_next(a_even), w2[3], preferred_element_type=f32))
    b_act = jnp.maximum(b_act + bias[1:2, :], 0.0).astype(cdt)   # (M, H)

    # ---- shared helper: k=3, s=1, p=1 conv as 3 shifted dots (f32 accumulate) ----
    def conv3x3(v, w):                                           # v (M,C) cdt, w (3,C,Co)
        return (jnp.dot(shift_prev(v), w[0], preferred_element_type=f32)
                + jnp.dot(v, w[1], preferred_element_type=f32)
                + jnp.dot(shift_next(v), w[2], preferred_element_type=f32))

    # ---- conv3: k=3, s=1, p=1 (no ReLU) --------------------------------------
    d = conv3x3(b_act, w3_ref[...]) + bias[2:3, :]               # (M, H) f32

    # ---- residual stack: n x [x + conv1x1(relu(conv3x3(relu(x))))] -----------
    # (weights SHARED across layers, bias-free convs), then the stack's final ReLU.
    rw3 = rw3_ref[...]
    rw1 = rw1_ref[...]

    def res_body(_, dd):
        h = jnp.maximum(dd, 0.0).astype(cdt)
        t = jnp.maximum(conv3x3(h, rw3), 0.0).astype(cdt)        # (M, R)
        return dd + jnp.dot(t, rw1, preferred_element_type=f32)

    d = jax.lax.fori_loop(0, n_res_layers, res_body, d,
                          unroll=(n_res_layers <= 4))

    # ---- final ReLU + in-kernel transpose to channel-major (NCW) output ------
    out = jnp.maximum(d, 0.0).reshape(B, L2, H)
    o_ref[...] = jnp.transpose(out, (0, 2, 1)).astype(o_ref.dtype)


# ---------------------------------------------------------------------------
# Wrapper: layout glue only (transpose / pad / fold / weight re-layout)
# ---------------------------------------------------------------------------
def encoder1d_forward(x_ncw, params, n_res_layers, *,
                      compute_dtype=jnp.bfloat16, batch_tile=None):
    """x_ncw: (N, in_dim, L) PyTorch NCW  ->  (N, h_dim, L // 4) (NCW)."""
    N, C_in, L = x_ncw.shape
    assert L % 4 == 0, "encoder downsamples by 4; L must be a multiple of 4"
    H1 = params["w1"].shape[0]
    H = params["w2"].shape[0]
    R = params["res_w3"].shape[0]
    assert H1 <= H, "packed bias layout assumes h_dim//2 <= h_dim"
    L2 = L // 4
    cdt = compute_dtype

    # Batch tile: stack enough batch elements per grid step to fill the MXU M dim
    # (target ~256 rows), while keeping the tile a divisor of N.  For v7x megacore
    # with tiny N one would trade B down to keep >=2 parallel grid steps; for long L
    # add a "parallel" length-tile axis with a 1-row halo sized for 64 MiB VMEM.
    if batch_tile is None:
        batch_tile = min(N, max(1, -(-256 // L2)))
        while N % batch_tile:
            batch_tile -= 1
    assert N % batch_tile == 0
    B = batch_tile

    # NCW -> channels-last, zero-pad L by (1, 3): 1 each side for the k=4 window plus
    # 2 dead rows so the stride-2 "fold" below is an exact (free) reshape.  Folding 4
    # consecutive positions into channels turns both stride-2 convs into unit-stride
    # matmuls inside the kernel (no im2col, no strided loads).  For very large
    # C_in * L this relayout would move inside the kernel; negligible here.
    x_nlc = jnp.transpose(x_ncw, (0, 2, 1))
    x_pad = jnp.pad(x_nlc, ((0, 0), (1, 3), (0, 0)))
    x_fold = x_pad.reshape(N, L2 + 1, 4 * C_in).astype(cdt)

    # PyTorch (C_out, C_in, K) conv weights -> tap-major (K, C_in, C_out) operands.
    def tapmajor(w_pt):
        return jnp.transpose(w_pt, (2, 1, 0)).astype(cdt)

    w1 = tapmajor(params["w1"]).reshape(4 * C_in, H1)   # fused (4*C_in, H1) for conv1
    w2 = tapmajor(params["w2"])                          # (4, H1, H)
    w3 = tapmajor(params["w3"])                          # (3, H, H)
    rw3 = tapmajor(params["res_w3"])                     # (3, H, R)
    rw1 = tapmajor(params["res_w1"]).reshape(R, H)       # (R, H)   (1x1 conv)
    bias = jnp.zeros((3, H), jnp.float32)
    bias = (bias.at[0, :H1].set(params["b1"])
                .at[1, :].set(params["b2"])
                .at[2, :].set(params["b3"]))

    kernel = functools.partial(_encoder1d_kernel, n_res_layers=n_res_layers)
    out_ncw = pl.pallas_call(
        kernel,
        out_shape=jax.ShapeDtypeStruct((N, H, L2), x_ncw.dtype),
        grid=(N // B,),
        in_specs=[
            pl.BlockSpec((B, L2 + 1, 4 * C_in), lambda n: (n, 0, 0)),
            pl.BlockSpec((4 * C_in, H1), lambda n: (0, 0)),
            pl.BlockSpec((4, H1, H), lambda n: (0, 0, 0)),
            pl.BlockSpec((3, H, H), lambda n: (0, 0, 0)),
            pl.BlockSpec((3, H, R), lambda n: (0, 0, 0)),
            pl.BlockSpec((R, H), lambda n: (0, 0)),
            pl.BlockSpec((3, H), lambda n: (0, 0)),
        ],
        out_specs=pl.BlockSpec((B, H, L2), lambda n: (n, 0, 0)),
        compiler_params=pltpu.CompilerParams(dimension_semantics=("parallel",)),
    )(x_fold, w1, w2, w3, rw3, rw1, bias)

    # Kernel already emits channel-major NCW output; no wrapper transpose.
    return out_ncw


# ---------------------------------------------------------------------------
# Pure-JAX reference (mirrors the PyTorch module) for correctness checking
# ---------------------------------------------------------------------------
def _conv1d_ref(x_ncw, w, b, stride, pad):
    out = jax.lax.conv_general_dilated(
        x_ncw, w, window_strides=(stride,), padding=[(pad, pad)],
        dimension_numbers=("NCH", "OIH", "NCH"))
    if b is not None:
        out = out + b[None, :, None]
    return out


def encoder1d_ref(x_ncw, params, n_res_layers):
    a = jax.nn.relu(_conv1d_ref(x_ncw, params["w1"], params["b1"], 2, 1))
    b = jax.nn.relu(_conv1d_ref(a, params["w2"], params["b2"], 2, 1))
    d = _conv1d_ref(b, params["w3"], params["b3"], 1, 1)
    for _ in range(n_res_layers):                    # shared weights across layers
        h = _conv1d_ref(jax.nn.relu(d), params["res_w3"], None, 1, 1)
        h = _conv1d_ref(jax.nn.relu(h), params["res_w1"], None, 1, 0)
        d = d + h
    return jax.nn.relu(d)                            # ResidualStack's final ReLU


# ---------------------------------------------------------------------------
if __name__ == "__main__":
    N, in_dim, L = 2, 4, 16
    h_dim, n_res_layers, res_h_dim = 32, 2, 8

    key = jax.random.PRNGKey(0)
    ks = jax.random.split(key, 9)
    params = {
        # conv_stack_1: Conv1d(in_dim, h_dim//2, k=4, s=2, p=1)  (PyTorch O,I,K layout)
        "w1": 0.1 * jax.random.normal(ks[0], (h_dim // 2, in_dim, 4), jnp.float32),
        "b1": 0.1 * jax.random.normal(ks[1], (h_dim // 2,), jnp.float32),
        # conv_stack_2: Conv1d(h_dim//2, h_dim, k=4, s=2, p=1)
        "w2": 0.1 * jax.random.normal(ks[2], (h_dim, h_dim // 2, 4), jnp.float32),
        "b2": 0.1 * jax.random.normal(ks[3], (h_dim,), jnp.float32),
        # conv_stack_3: Conv1d(h_dim, h_dim, k=3, s=1, p=1)
        "w3": 0.1 * jax.random.normal(ks[4], (h_dim, h_dim, 3), jnp.float32),
        "b3": 0.1 * jax.random.normal(ks[5], (h_dim,), jnp.float32),
        # shared residual-layer weights (bias-free convs), PyTorch layouts
        "res_w3": 0.1 * jax.random.normal(ks[6], (res_h_dim, h_dim, 3), jnp.float32),
        "res_w1": 0.1 * jax.random.normal(ks[7], (h_dim, res_h_dim, 1), jnp.float32),
    }
    x = jax.random.normal(ks[8], (N, in_dim, L), jnp.float32)

    ref = jax.block_until_ready(encoder1d_ref(x, params, n_res_layers))

    # f32-operand path: tight tolerance.
    fwd_f32 = jax.jit(functools.partial(encoder1d_forward, n_res_layers=n_res_layers,
                                        compute_dtype=jnp.float32))
    out_f32 = jax.block_until_ready(fwd_f32(x, params))
    assert out_f32.shape == (N, h_dim, L // 4), out_f32.shape
    assert jnp.allclose(out_f32, ref, atol=1e-4, rtol=1e-4), \
        float(jnp.max(jnp.abs(out_f32 - ref)))

    # batch_tile=1 path (exercises the per-batch grid / no-mask code path).
    out_b1 = jax.block_until_ready(
        encoder1d_forward(x, params, n_res_layers,
                          compute_dtype=jnp.float32, batch_tile=1))
    assert jnp.allclose(out_b1, ref, atol=1e-4, rtol=1e-4), \
        float(jnp.max(jnp.abs(out_b1 - ref)))

    # Default bf16 operand / f32 accumulation path (all TPU generations).
    fwd_bf16 = jax.jit(functools.partial(encoder1d_forward, n_res_layers=n_res_layers))
    out_bf16 = jax.block_until_ready(fwd_bf16(x, params))
    assert jnp.allclose(out_bf16, ref, atol=5e-2, rtol=5e-2), \
        float(jnp.max(jnp.abs(out_bf16 - ref)))

    print("KERNEL_OK")
</pallas_src>

<mosaic_0001>
module attributes {stable_mosaic.version = 11 : i64} {
  func.func @_encoder1d_kernel(%arg0: i32, %arg1: memref<2x5x16xf32, #tpu.memory_space<vmem>>, %arg2: memref<16x16xf32, #tpu.memory_space<vmem>>, %arg3: memref<4x16x32xf32, #tpu.memory_space<vmem>>, %arg4: memref<3x32x32xf32, #tpu.memory_space<vmem>>, %arg5: memref<3x32x8xf32, #tpu.memory_space<vmem>>, %arg6: memref<8x32xf32, #tpu.memory_space<vmem>>, %arg7: memref<3x32xf32, #tpu.memory_space<vmem>>, %arg8: memref<2x32x4xf32, #tpu.memory_space<vmem>>) attributes {dimension_semantics = [#tpu.dimension_semantics<parallel>], iteration_bounds = array<i64: 1>, scalar_prefetch = 0 : i64, scratch_operands = 0 : i64, tpu.core_type = #tpu.core_type<tc>, window_params = [{transform_indices = @transform_0, window_bounds = array<i64: 2, 5, 16>}, {pipeline_mode = #tpu.pipeline_mode<synchronous>, transform_indices = @transform_1, window_bounds = array<i64: 16, 16>}, {pipeline_mode = #tpu.pipeline_mode<synchronous>, transform_indices = @transform_2, window_bounds = array<i64: 4, 16, 32>}, {pipeline_mode = #tpu.pipeline_mode<synchronous>, transform_indices = @transform_3, window_bounds = array<i64: 3, 32, 32>}, {pipeline_mode = #tpu.pipeline_mode<synchronous>, transform_indices = @transform_4, window_bounds = array<i64: 3, 32, 8>}, {pipeline_mode = #tpu.pipeline_mode<synchronous>, transform_indices = @transform_5, window_bounds = array<i64: 8, 32>}, {pipeline_mode = #tpu.pipeline_mode<synchronous>, transform_indices = @transform_6, window_bounds = array<i64: 3, 32>}, {transform_indices = @transform_7, window_bounds = array<i64: 2, 32, 4>}]} {
    %c0 = arith.constant 0 : index
    %c0_0 = arith.constant 0 : index
    %0 = vector.load %arg7[%c0, %c0_0] : memref<3x32xf32, #tpu.memory_space<vmem>>, vector<3x32xf32>
    %1 = tpu.iota {dimensions = array<i32: 0>} : vector<8x1xi32>
    %c4_i32 = arith.constant 4 : i32
    %c0_i32 = arith.constant 0 : i32
    %2 = arith.cmpi eq, %c4_i32, %c0_i32 : i32
    %c1_i32 = arith.constant 1 : i32
    %3 = arith.select %2, %c1_i32, %c4_i32 : i32
    %4 = vector.broadcast %3 : i32 to vector<8x1xi32>
    %5 = arith.remsi %1, %4 : vector<8x1xi32>
    %c0_i32_1 = arith.constant 0 : i32
    %6 = vector.broadcast %c0_i32_1 : i32 to vector<8x1xi32>
    %7 = arith.cmpi ne, %5, %6 : vector<8x1xi32>
    %c0_i32_2 = arith.constant 0 : i32
    %8 = vector.broadcast %c0_i32_2 : i32 to vector<8x1xi32>
    %9 = arith.cmpi slt, %5, %8 : vector<8x1xi32>
    %c0_i32_3 = arith.constant 0 : i32
    %10 = arith.cmpi slt, %3, %c0_i32_3 : i32
    %11 = vector.broadcast %10 : i1 to vector<8x1xi1>
    %12 = vector.broadcast %11 : vector<8x1xi1> to vector<8x1xi1>
    %13 = arith.xori %9, %12 : vector<8x1xi1>
    %14 = arith.andi %13, %7 : vector<8x1xi1>
    %15 = vector.broadcast %3 : i32 to vector<8x1xi32>
    %16 = arith.addi %5, %15 : vector<8x1xi32>
    %17 = arith.select %14, %16, %5 : vector<8x1xi1>, vector<8x1xi32>
    %c0_i32_4 = arith.constant 0 : i32
    %18 = vector.broadcast %c0_i32_4 : i32 to vector<8x1xi32>
    %19 = arith.cmpi ne, %17, %18 : vector<8x1xi32>
    %c4_i32_5 = arith.constant 4 : i32
    %c0_i32_6 = arith.constant 0 : i32
    %20 = arith.cmpi eq, %c4_i32_5, %c0_i32_6 : i32
    %c1_i32_7 = arith.constant 1 : i32
    %21 = arith.select %20, %c1_i32_7, %c4_i32_5 : i32
    %22 = vector.broadcast %21 : i32 to vector<8x1xi32>
    %23 = arith.remsi %1, %22 : vector<8x1xi32>
    %c0_i32_8 = arith.constant 0 : i32
    %24 = vector.broadcast %c0_i32_8 : i32 to vector<8x1xi32>
    %25 = arith.cmpi ne, %23, %24 : vector<8x1xi32>
    %c0_i32_9 = arith.constant 0 : i32
    %26 = vector.broadcast %c0_i32_9 : i32 to vector<8x1xi32>
    %27 = arith.cmpi slt, %23, %26 : vector<8x1xi32>
    %c0_i32_10 = arith.constant 0 : i32
    %28 = arith.cmpi slt, %21, %c0_i32_10 : i32
    %29 = vector.broadcast %28 : i1 to vector<8x1xi1>
    %30 = vector.broadcast %29 : vector<8x1xi1> to vector<8x1xi1>
    %31 = arith.xori %27, %30 : vector<8x1xi1>
    %32 = arith.andi %31, %25 : vector<8x1xi1>
    %33 = vector.broadcast %21 : i32 to vector<8x1xi32>
    %34 = arith.addi %23, %33 : vector<8x1xi32>
    %35 = arith.select %32, %34, %23 : vector<8x1xi1>, vector<8x1xi32>
    %c3_i32 = arith.constant 3 : i32
    %36 = vector.broadcast %c3_i32 : i32 to vector<8x1xi32>
    %37 = arith.cmpi ne, %35, %36 : vector<8x1xi32>
    %c0_11 = arith.constant 0 : index
    %c0_12 = arith.constant 0 : index
    %c0_13 = arith.constant 0 : index
    %38 = vector.load %arg1[%c0_11, %c0_12, %c0_13] : memref<2x5x16xf32, #tpu.memory_space<vmem>>, vector<2x5x16xf32>
    %39 = vector.extract_strided_slice %38 {offsets = [0, 0, 0], sizes = [2, 4, 16], strides = [1, 1, 1]} : vector<2x5x16xf32> to vector<2x4x16xf32>
    %40 = vector.shape_cast %39 : vector<2x4x16xf32> to vector<8x16xf32>
    %41 = vector.extract_strided_slice %38 {offsets = [0, 0, 8], sizes = [2, 4, 8], strides = [1, 1, 1]} : vector<2x5x16xf32> to vector<2x4x8xf32>
    %42 = vector.extract_strided_slice %38 {offsets = [0, 1, 0], sizes = [2, 4, 8], strides = [1, 1, 1]} : vector<2x5x16xf32> to vector<2x4x8xf32>
    %43 = tpu.concatenate %41, %42 in 2 : vector<2x4x8xf32>, vector<2x4x8xf32> -> vector<2x4x16xf32>
    %44 = vector.shape_cast %43 : vector<2x4x16xf32> to vector<8x16xf32>
    %45 = tpu.concatenate %40, %44 in 0 : vector<8x16xf32>, vector<8x16xf32> -> vector<16x16xf32>
    %c0_14 = arith.constant 0 : index
    %c0_15 = arith.constant 0 : index
    %46 = vector.load %arg2[%c0_14, %c0_15] : memref<16x16xf32, #tpu.memory_space<vmem>>, vector<16x16xf32>
    %cst = arith.constant dense<0.000000e+00> : vector<16x16xf32>
    %47 = tpu.matmul %45, %46, %cst {dimension_numbers = #tpu.dot_dimension_numbers<[1], [0], [0], [1], [0, 0, 1, 1], [], []>} : vector<16x16xf32>, vector<16x16xf32>, vector<16x16xf32> -> vector<16x16xf32>
    %48 = vector.extract_strided_slice %0 {offsets = [0, 0], sizes = [1, 16], strides = [1, 1]} : vector<3x32xf32> to vector<1x16xf32>
    %49 = vector.broadcast %48 : vector<1x16xf32> to vector<16x16xf32>
    %50 = arith.addf %47, %49 : vector<16x16xf32>
    %cst_16 = arith.constant 0.000000e+00 : f32
    %51 = vector.broadcast %cst_16 : f32 to vector<16x16xf32>
    %52 = arith.maximumf %50, %51 : vector<16x16xf32>
    %53 = vector.extract_strided_slice %52 {offsets = [0, 0], sizes = [8, 16], strides = [1, 1]} : vector<16x16xf32> to vector<8x16xf32>
    %54 = vector.extract_strided_slice %52 {offsets = [8, 0], sizes = [8, 16], strides = [1, 1]} : vector<16x16xf32> to vector<8x16xf32>
    %c0_17 = arith.constant 0 : index
    %c0_18 = arith.constant 0 : index
    %c0_19 = arith.constant 0 : index
    %55 = vector.load %arg3[%c0_17, %c0_18, %c0_19] : memref<4x16x32xf32, #tpu.memory_space<vmem>>, vector<4x16x32xf32>
    %cst_20 = arith.constant 0.000000e+00 : f32
    %56 = vector.broadcast %cst_20 : f32 to vector<1x16xf32>
    %57 = vector.extract_strided_slice %54 {offsets = [0, 0], sizes = [7, 16], strides = [1, 1]} : vector<8x16xf32> to vector<7x16xf32>
    %58 = tpu.concatenate %56, %57 in 0 : vector<1x16xf32>, vector<7x16xf32> -> vector<8x16xf32>
    %cst_21 = arith.constant 0.000000e+00 : f32
    %59 = vector.shape_cast %19 : vector<8x1xi1> to vector<8x1xi1>
    %60 = vector.broadcast %59 : vector<8x1xi1> to vector<8x16xi1>
    %61 = vector.broadcast %cst_21 : f32 to vector<8x16xf32>
    %62 = arith.select %60, %58, %61 : vector<8x16xi1>, vector<8x16xf32>
    %63 = vector.extract_strided_slice %55 {offsets = [0, 0, 0], sizes = [1, 16, 32], strides = [1, 1, 1]} : vector<4x16x32xf32> to vector<1x16x32xf32>
    %64 = vector.shape_cast %63 : vector<1x16x32xf32> to vector<16x32xf32>
    %cst_22 = arith.constant dense<0.000000e+00> : vector<8x32xf32>
    %65 = tpu.matmul %62, %64, %cst_22 {dimension_numbers = #tpu.dot_dimension_numbers<[1], [0], [0], [1], [0, 0, 1, 1], [], []>} : vector<8x16xf32>, vector<16x32xf32>, vector<8x32xf32> -> vector<8x32xf32>
    %66 = vector.extract_strided_slice %55 {offsets = [1, 0, 0], sizes = [1, 16, 32], strides = [1, 1, 1]} : vector<4x16x32xf32> to vector<1x16x32xf32>
    %67 = vector.shape_cast %66 : vector<1x16x32xf32> to vector<16x32xf32>
    %cst_23 = arith.constant dense<0.000000e+00> : vector<8x32xf32>
    %68 = tpu.matmul %53, %67, %cst_23 {dimension_numbers = #tpu.dot_dimension_numbers<[1], [0], [0], [1], [0, 0, 1, 1], [], []>} : vector<8x16xf32>, vector<16x32xf32>, vector<8x32xf32> -> vector<8x32xf32>
    %69 = arith.addf %65, %68 : vector<8x32xf32>
    %70 = vector.extract_strided_slice %55 {offsets = [2, 0, 0], sizes = [1, 16, 32], strides = [1, 1, 1]} : vector<4x16x32xf32> to vector<1x16x32xf32>
    %71 = vector.shape_cast %70 : vector<1x16x32xf32> to vector<16x32xf32>
    %cst_24 = arith.constant dense<0.000000e+00> : vector<8x32xf32>
    %72 = tpu.matmul %54, %71, %cst_24 {dimension_numbers = #tpu.dot_dimension_numbers<[1], [0], [0], [1], [0, 0, 1, 1], [], []>} : vector<8x16xf32>, vector<16x32xf32>, vector<8x32xf32> -> vector<8x32xf32>
    %73 = arith.addf %69, %72 : vector<8x32xf32>
    %cst_25 = arith.constant 0.000000e+00 : f32
    %74 = vector.broadcast %cst_25 : f32 to vector<1x16xf32>
    %75 = vector.extract_strided_slice %53 {offsets = [1, 0], sizes = [7, 16], strides = [1, 1]} : vector<8x16xf32> to vector<7x16xf32>
    %76 = tpu.concatenate %75, %74 in 0 : vector<7x16xf32>, vector<1x16xf32> -> vector<8x16xf32>
    %cst_26 = arith.constant 0.000000e+00 : f32
    %77 = vector.shape_cast %37 : vector<8x1xi1> to vector<8x1xi1>
    %78 = vector.broadcast %77 : vector<8x1xi1> to vector<8x16xi1>
    %79 = vector.broadcast %cst_26 : f32 to vector<8x16xf32>
    %80 = arith.select %78, %76, %79 : vector<8x16xi1>, vector<8x16xf32>
    %81 = vector.extract_strided_slice %55 {offsets = [3, 0, 0], sizes = [1, 16, 32], strides = [1, 1, 1]} : vector<4x16x32xf32> to vector<1x16x32xf32>
    %82 = vector.shape_cast %81 : vector<1x16x32xf32> to vector<16x32xf32>
    %cst_27 = arith.constant dense<0.000000e+00> : vector<8x32xf32>
    %83 = tpu.matmul %80, %82, %cst_27 {dimension_numbers = #tpu.dot_dimension_numbers<[1], [0], [0], [1], [0, 0, 1, 1], [], []>} : vector<8x16xf32>, vector<16x32xf32>, vector<8x32xf32> -> vector<8x32xf32>
    %84 = arith.addf %73, %83 : vector<8x32xf32>
    %85 = vector.extract_strided_slice %0 {offsets = [1, 0], sizes = [1, 32], strides = [1, 1]} : vector<3x32xf32> to vector<1x32xf32>
    %86 = vector.broadcast %85 : vector<1x32xf32> to vector<8x32xf32>
    %87 = arith.addf %84, %86 : vector<8x32xf32>
    %cst_28 = arith.constant 0.000000e+00 : f32
    %88 = vector.broadcast %cst_28 : f32 to vector<8x32xf32>
    %89 = arith.maximumf %87, %88 : vector<8x32xf32>
    %c0_29 = arith.constant 0 : index
    %c0_30 = arith.constant 0 : index
    %c0_31 = arith.constant 0 : index
    %90 = vector.load %arg4[%c0_29, %c0_30, %c0_31] : memref<3x32x32xf32, #tpu.memory_space<vmem>>, vector<3x32x32xf32>
    %cst_32 = arith.constant 0.000000e+00 : f32
    %91 = vector.broadcast %cst_32 : f32 to vector<1x32xf32>
    %92 = vector.extract_strided_slice %89 {offsets = [0, 0], sizes = [7, 32], strides = [1, 1]} : vector<8x32xf32> to vector<7x32xf32>
    %93 = tpu.concatenate %91, %92 in 0 : vector<1x32xf32>, vector<7x32xf32> -> vector<8x32xf32>
    %cst_33 = arith.constant 0.000000e+00 : f32
    %94 = vector.shape_cast %19 : vector<8x1xi1> to vector<8x1xi1>
    %95 = vector.broadcast %94 : vector<8x1xi1> to vector<8x32xi1>
    %96 = vector.broadcast %cst_33 : f32 to vector<8x32xf32>
    %97 = arith.select %95, %93, %96 : vector<8x32xi1>, vector<8x32xf32>
    %98 = vector.extract_strided_slice %90 {offsets = [0, 0, 0], sizes = [1, 32, 32], strides = [1, 1, 1]} : vector<3x32x32xf32> to vector<1x32x32xf32>
    %99 = vector.shape_cast %98 : vector<1x32x32xf32> to vector<32x32xf32>
    %cst_34 = arith.constant dense<0.000000e+00> : vector<8x32xf32>
    %100 = tpu.matmul %97, %99, %cst_34 {dimension_numbers = #tpu.dot_dimension_numbers<[1], [0], [0], [1], [0, 0, 1, 1], [], []>} : vector<8x32xf32>, vector<32x32xf32>, vector<8x32xf32> -> vector<8x32xf32>
    %101 = vector.extract_strided_slice %90 {offsets = [1, 0, 0], sizes = [1, 32, 32], strides = [1, 1, 1]} : vector<3x32x32xf32> to vector<1x32x32xf32>
    %102 = vector.shape_cast %101 : vector<1x32x32xf32> to vector<32x32xf32>
    %cst_35 = arith.constant dense<0.000000e+00> : vector<8x32xf32>
    %103 = tpu.matmul %89, %102, %cst_35 {dimension_numbers = #tpu.dot_dimension_numbers<[1], [0], [0], [1], [0, 0, 1, 1], [], []>} : vector<8x32xf32>, vector<32x32xf32>, vector<8x32xf32> -> vector<8x32xf32>
    %104 = arith.addf %100, %103 : vector<8x32xf32>
    %cst_36 = arith.constant 0.000000e+00 : f32
    %105 = vector.broadcast %cst_36 : f32 to vector<1x32xf32>
    %106 = vector.extract_strided_slice %89 {offsets = [1, 0], sizes = [7, 32], strides = [1, 1]} : vector<8x32xf32> to vector<7x32xf32>
    %107 = tpu.concatenate %106, %105 in 0 : vector<7x32xf32>, vector<1x32xf32> -> vector<8x32xf32>
    %cst_37 = arith.constant 0.000000e+00 : f32
    %108 = vector.shape_cast %37 : vector<8x1xi1> to vector<8x1xi1>
    %109 = vector.broadcast %108 : vector<8x1xi1> to vector<8x32xi1>
    %110 = vector.broadcast %cst_37 : f32 to vector<8x32xf32>
    %111 = arith.select %109, %107, %110 : vector<8x32xi1>, vector<8x32xf32>
    %112 = vector.extract_strided_slice %90 {offsets = [2, 0, 0], sizes = [1, 32, 32], strides = [1, 1, 1]} : vector<3x32x32xf32> to vector<1x32x32xf32>
    %113 = vector.shape_cast %112 : vector<1x32x32xf32> to vector<32x32xf32>
    %cst_38 = arith.constant dense<0.000000e+00> : vector<8x32xf32>
    %114 = tpu.matmul %111, %113, %cst_38 {dimension_numbers = #tpu.dot_dimension_numbers<[1], [0], [0], [1], [0, 0, 1, 1], [], []>} : vector<8x32xf32>, vector<32x32xf32>, vector<8x32xf32> -> vector<8x32xf32>
    %115 = arith.addf %104, %114 : vector<8x32xf32>
    %116 = vector.extract_strided_slice %0 {offsets = [2, 0], sizes = [1, 32], strides = [1, 1]} : vector<3x32xf32> to vector<1x32xf32>
    %117 = vector.broadcast %116 : vector<1x32xf32> to vector<8x32xf32>
    %118 = arith.addf %115, %117 : vector<8x32xf32>
    %c0_39 = arith.constant 0 : index
    %c0_40 = arith.constant 0 : index
    %c0_41 = arith.constant 0 : index
    %119 = vector.load %arg5[%c0_39, %c0_40, %c0_41] : memref<3x32x8xf32, #tpu.memory_space<vmem>>, vector<3x32x8xf32>
    %c0_42 = arith.constant 0 : index
    %c0_43 = arith.constant 0 : index
    %120 = vector.load %arg6[%c0_42, %c0_43] : memref<8x32xf32, #tpu.memory_space<vmem>>, vector<8x32xf32>
    %c0_i32_44 = arith.constant 0 : i32
    %cst_45 = arith.constant 0.000000e+00 : f32
    %121 = vector.broadcast %cst_45 : f32 to vector<8x32xf32>
    %122 = arith.maximumf %118, %121 : vector<8x32xf32>
    %cst_46 = arith.constant 0.000000e+00 : f32
    %123 = vector.broadcast %cst_46 : f32 to vector<1x32xf32>
    %124 = vector.extract_strided_slice %122 {offsets = [0, 0], sizes = [7, 32], strides = [1, 1]} : vector<8x32xf32> to vector<7x32xf32>
    %125 = tpu.concatenate %123, %124 in 0 : vector<1x32xf32>, vector<7x32xf32> -> vector<8x32xf32>
    %cst_47 = arith.constant 0.000000e+00 : f32
    %126 = vector.shape_cast %19 : vector<8x1xi1> to vector<8x1xi1>
    %127 = vector.broadcast %126 : vector<8x1xi1> to vector<8x32xi1>
    %128 = vector.broadcast %cst_47 : f32 to vector<8x32xf32>
    %129 = arith.select %127, %125, %128 : vector<8x32xi1>, vector<8x32xf32>
    %130 = vector.extract_strided_slice %119 {offsets = [0, 0, 0], sizes = [1, 32, 8], strides = [1, 1, 1]} : vector<3x32x8xf32> to vector<1x32x8xf32>
    %131 = vector.shape_cast %130 : vector<1x32x8xf32> to vector<32x8xf32>
    %cst_48 = arith.constant dense<0.000000e+00> : vector<8x8xf32>
    %132 = tpu.matmul %129, %131, %cst_48 {dimension_numbers = #tpu.dot_dimension_numbers<[1], [0], [0], [1], [0, 0, 1, 1], [], []>} : vector<8x32xf32>, vector<32x8xf32>, vector<8x8xf32> -> vector<8x8xf32>
    %133 = vector.extract_strided_slice %119 {offsets = [1, 0, 0], sizes = [1, 32, 8], strides = [1, 1, 1]} : vector<3x32x8xf32> to vector<1x32x8xf32>
    %134 = vector.shape_cast %133 : vector<1x32x8xf32> to vector<32x8xf32>
    %cst_49 = arith.constant dense<0.000000e+00> : vector<8x8xf32>
    %135 = tpu.matmul %122, %134, %cst_49 {dimension_numbers = #tpu.dot_dimension_numbers<[1], [0], [0], [1], [0, 0, 1, 1], [], []>} : vector<8x32xf32>, vector<32x8xf32>, vector<8x8xf32> -> vector<8x8xf32>
    %136 = arith.addf %132, %135 : vector<8x8xf32>
    %cst_50 = arith.constant 0.000000e+00 : f32
    %137 = vector.broadcast %cst_50 : f32 to vector<1x32xf32>
    %138 = vector.extract_strided_slice %122 {offsets = [1, 0], sizes = [7, 32], strides = [1, 1]} : vector<8x32xf32> to vector<7x32xf32>
    %139 = tpu.concatenate %138, %137 in 0 : vector<7x32xf32>, vector<1x32xf32> -> vector<8x32xf32>
    %cst_51 = arith.constant 0.000000e+00 : f32
    %140 = vector.shape_cast %37 : vector<8x1xi1> to vector<8x1xi1>
    %141 = vector.broadcast %140 : vector<8x1xi1> to vector<8x32xi1>
    %142 = vector.broadcast %cst_51 : f32 to vector<8x32xf32>
    %143 = arith.select %141, %139, %142 : vector<8x32xi1>, vector<8x32xf32>
    %144 = vector.extract_strided_slice %119 {offsets = [2, 0, 0], sizes = [1, 32, 8], strides = [1, 1, 1]} : vector<3x32x8xf32> to vector<1x32x8xf32>
    %145 = vector.shape_cast %144 : vector<1x32x8xf32> to vector<32x8xf32>
    %cst_52 = arith.constant dense<0.000000e+00> : vector<8x8xf32>
    %146 = tpu.matmul %143, %145, %cst_52 {dimension_numbers = #tpu.dot_dimension_numbers<[1], [0], [0], [1], [0, 0, 1, 1], [], []>} : vector<8x32xf32>, vector<32x8xf32>, vector<8x8xf32> -> vector<8x8xf32>
    %147 = arith.addf %136, %146 : vector<8x8xf32>
    %cst_53 = arith.constant 0.000000e+00 : f32
    %148 = vector.broadcast %cst_53 : f32 to vector<8x8xf32>
    %149 = arith.maximumf %147, %148 : vector<8x8xf32>
    %cst_54 = arith.constant dense<0.000000e+00> : vector<8x32xf32>
    %150 = tpu.matmul %149, %120, %cst_54 {dimension_numbers = #tpu.dot_dimension_numbers<[1], [0], [0], [1], [0, 0, 1, 1], [], []>} : vector<8x8xf32>, vector<8x32xf32>, vector<8x32xf32> -> vector<8x32xf32>
    %151 = arith.addf %118, %150 : vector<8x32xf32>
    %c1_i32_55 = arith.constant 1 : i32
    %cst_56 = arith.constant 0.000000e+00 : f32
    %152 = vector.broadcast %cst_56 : f32 to vector<8x32xf32>
    %153 = arith.maximumf %151, %152 : vector<8x32xf32>
    %cst_57 = arith.constant 0.000000e+00 : f32
    %154 = vector.broadcast %cst_57 : f32 to vector<1x32xf32>
    %155 = vector.extract_strided_slice %153 {offsets = [0, 0], sizes = [7, 32], strides = [1, 1]} : vector<8x32xf32> to vector<7x32xf32>
    %156 = tpu.concatenate %154, %155 in 0 : vector<1x32xf32>, vector<7x32xf32> -> vector<8x32xf32>
    %cst_58 = arith.constant 0.000000e+00 : f32
    %157 = vector.shape_cast %19 : vector<8x1xi1> to vector<8x1xi1>
    %158 = vector.broadcast %157 : vector<8x1xi1> to vector<8x32xi1>
    %159 = vector.broadcast %cst_58 : f32 to vector<8x32xf32>
    %160 = arith.select %158, %156, %159 : vector<8x32xi1>, vector<8x32xf32>
    %161 = vector.extract_strided_slice %119 {offsets = [0, 0, 0], sizes = [1, 32, 8], strides = [1, 1, 1]} : vector<3x32x8xf32> to vector<1x32x8xf32>
    %162 = vector.shape_cast %161 : vector<1x32x8xf32> to vector<32x8xf32>
    %cst_59 = arith.constant dense<0.000000e+00> : vector<8x8xf32>
    %163 = tpu.matmul %160, %162, %cst_59 {dimension_numbers = #tpu.dot_dimension_numbers<[1], [0], [0], [1], [0, 0, 1, 1], [], []>} : vector<8x32xf32>, vector<32x8xf32>, vector<8x8xf32> -> vector<8x8xf32>
    %164 = vector.extract_strided_slice %119 {offsets = [1, 0, 0], sizes = [1, 32, 8], strides = [1, 1, 1]} : vector<3x32x8xf32> to vector<1x32x8xf32>
    %165 = vector.shape_cast %164 : vector<1x32x8xf32> to vector<32x8xf32>
    %cst_60 = arith.constant dense<0.000000e+00> : vector<8x8xf32>
    %166 = tpu.matmul %153, %165, %cst_60 {dimension_numbers = #tpu.dot_dimension_numbers<[1], [0], [0], [1], [0, 0, 1, 1], [], []>} : vector<8x32xf32>, vector<32x8xf32>, vector<8x8xf32> -> vector<8x8xf32>
    %167 = arith.addf %163, %166 : vector<8x8xf32>
    %cst_61 = arith.constant 0.000000e+00 : f32
    %168 = vector.broadcast %cst_61 : f32 to vector<1x32xf32>
    %169 = vector.extract_strided_slice %153 {offsets = [1, 0], sizes = [7, 32], strides = [1, 1]} : vector<8x32xf32> to vector<7x32xf32>
    %170 = tpu.concatenate %169, %168 in 0 : vector<7x32xf32>, vector<1x32xf32> -> vector<8x32xf32>
    %cst_62 = arith.constant 0.000000e+00 : f32
    %171 = vector.shape_cast %37 : vector<8x1xi1> to vector<8x1xi1>
    %172 = vector.broadcast %171 : vector<8x1xi1> to vector<8x32xi1>
    %173 = vector.broadcast %cst_62 : f32 to vector<8x32xf32>
    %174 = arith.select %172, %170, %173 : vector<8x32xi1>, vector<8x32xf32>
    %175 = vector.extract_strided_slice %119 {offsets = [2, 0, 0], sizes = [1, 32, 8], strides = [1, 1, 1]} : vector<3x32x8xf32> to vector<1x32x8xf32>
    %176 = vector.shape_cast %175 : vector<1x32x8xf32> to vector<32x8xf32>
    %cst_63 = arith.constant dense<0.000000e+00> : vector<8x8xf32>
    %177 = tpu.matmul %174, %176, %cst_63 {dimension_numbers = #tpu.dot_dimension_numbers<[1], [0], [0], [1], [0, 0, 1, 1], [], []>} : vector<8x32xf32>, vector<32x8xf32>, vector<8x8xf32> -> vector<8x8xf32>
    %178 = arith.addf %167, %177 : vector<8x8xf32>
    %cst_64 = arith.constant 0.000000e+00 : f32
    %179 = vector.broadcast %cst_64 : f32 to vector<8x8xf32>
    %180 = arith.maximumf %178, %179 : vector<8x8xf32>
    %cst_65 = arith.constant dense<0.000000e+00> : vector<8x32xf32>
    %181 = tpu.matmul %180, %120, %cst_65 {dimension_numbers = #tpu.dot_dimension_numbers<[1], [0], [0], [1], [0, 0, 1, 1], [], []>} : vector<8x8xf32>, vector<8x32xf32>, vector<8x32xf32> -> vector<8x32xf32>
    %182 = arith.addf %151, %181 : vector<8x32xf32>
    %cst_66 = arith.constant 0.000000e+00 : f32
    %183 = vector.broadcast %cst_66 : f32 to vector<8x32xf32>
    %184 = arith.maximumf %182, %183 : vector<8x32xf32>
    %185 = vector.shape_cast %184 : vector<8x32xf32> to vector<2x4x32xf32>
    %186 = tpu.transpose %185, [0, 2, 1] : vector<2x4x32xf32> -> vector<2x32x4xf32>
    %c0_67 = arith.constant 0 : index
    %c0_68 = arith.constant 0 : index
    %c0_69 = arith.constant 0 : index
    %187 = vector.load %arg8[%c0_67, %c0_68, %c0_69] : memref<2x32x4xf32, #tpu.memory_space<vmem>>, vector<2x32x4xf32>
    tpu.vector_store %arg8[%c0_67, %c0_68, %c0_69], %186 {strides = array<i32>} : memref<2x32x4xf32, #tpu.memory_space<vmem>>, vector<2x32x4xf32>,
    return
  }
  func.func @transform_0(%arg0: i32) -> (i32, i32, i32) {
    %c0_i32 = arith.constant 0 : i32
    %c0_i32_0 = arith.constant 0 : i32
    %c0_i32_1 = arith.constant 0 : i32
    return %arg0, %c0_i32, %c0_i32_0 : i32, i32, i32
  }
  func.func @transform_1(%arg0: i32) -> (i32, i32) {
    %c0_i32 = arith.constant 0 : i32
    %c0_i32_0 = arith.constant 0 : i32
    %c0_i32_1 = arith.constant 0 : i32
    return %c0_i32, %c0_i32_0 : i32, i32
  }
  func.func @transform_2(%arg0: i32) -> (i32, i32, i32) {
    %c0_i32 = arith.constant 0 : i32
    %c0_i32_0 = arith.constant 0 : i32
    %c0_i32_1 = arith.constant 0 : i32
    %c0_i32_2 = arith.constant 0 : i32
    return %c0_i32, %c0_i32_0, %c0_i32_1 : i32, i32, i32
  }
  func.func @transform_3(%arg0: i32) -> (i32, i32, i32) {
    %c0_i32 = arith.constant 0 : i32
    %c0_i32_0 = arith.constant 0 : i32
    %c0_i32_1 = arith.constant 0 : i32
    %c0_i32_2 = arith.constant 0 : i32
    return %c0_i32, %c0_i32_0, %c0_i32_1 : i32, i32, i32
  }
  func.func @transform_4(%arg0: i32) -> (i32, i32, i32) {
    %c0_i32 = arith.constant 0 : i32
    %c0_i32_0 = arith.constant 0 : i32
    %c0_i32_1 = arith.constant 0 : i32
    %c0_i32_2 = arith.constant 0 : i32
    return %c0_i32, %c0_i32_0, %c0_i32_1 : i32, i32, i32
  }
  func.func @transform_5(%arg0: i32) -> (i32, i32) {
    %c0_i32 = arith.constant 0 : i32
    %c0_i32_0 = arith.constant 0 : i32
    %c0_i32_1 = arith.constant 0 : i32
    return %c0_i32, %c0_i32_0 : i32, i32
  }
  func.func @transform_6(%arg0: i32) -> (i32, i32) {
    %c0_i32 = arith.constant 0 : i32
    %c0_i32_0 = arith.constant 0 : i32
    %c0_i32_1 = arith.constant 0 : i32
    return %c0_i32, %c0_i32_0 : i32, i32
  }
  func.func @transform_7(%arg0: i32) -> (i32, i32, i32) {
    %c0_i32 = arith.constant 0 : i32
    %c0_i32_0 = arith.constant 0 : i32
    %c0_i32_1 = arith.constant 0 : i32
    return %arg0, %c0_i32, %c0_i32_0 : i32, i32, i32
  }
}

</mosaic_0001>

<bundles_post_ra>
// kernel: encoder1d_forward.1
= control target key start
LH: loop header
LB: loop body
LE: loop exit
PB: predicated region body
PF: predicated region fallthrough
CT: control target
= control target key end

     0   :  { %vm74_vm0 = vcmask 130048   ;;  %s1736_s30 = smov 120   ;;  %s1737_s10 = smov 8   ;;  %vm61_vm1 = vcmask 64512   ;;  %v1738_v18 = vmov 0.0|0.0   ;;  %vm1739_vm2 = vmmov 0   ;;  %s2043_s0 = inlined_call_operand.vmem [shape: f32[2,5,16], index: 0, kind: input, shape index: {}]   ;;  %s2044_s1 = inlined_call_operand.vmem [shape: f32[16,16], index: 1, kind: input, shape index: {}]   ;;  %s2045_s2 = inlined_call_operand.vmem [shape: f32[4,16,32], index: 2, kind: input, shape index: {}]   ;;  %s2046_s6 = inlined_call_operand.vmem [shape: f32[3,32], index: 6, kind: input, shape index: {}]   ;;  %s2047_s3 = inlined_call_operand.vmem [shape: f32[3,32,32], index: 3, kind: input, shape index: {}]   ;;  %s2048_s4 = inlined_call_operand.vmem [shape: f32[3,32,8], index: 4, kind: input, shape index: {}]   ;;  %s2049_s5 = inlined_call_operand.vmem [shape: f32[8,32], index: 5, kind: input, shape index: {}]   ;;  %s2050_s7 = inlined_call_operand.vmem [shape: f32[2,32,4], index: 7, kind: output, shape index: {}]  }
   0x1   :  { %v43_v0 = vld [vmem:[%s2043_s0] sm:$0x1f]  ;;  %v44_v1 = vld [vmem:[%s2043_s0 + $0x8] sm:$0x1f]  ;;  %v158_v15 = vld [vmem:[%s2045_s2 + $0x10] sm:$0xff]  ;;  %1656 = vmatprep.subr.bf16.mxu1 %v1738_v18  ;;  %v1740_v22 = vmov 0.0   ;;  %v27_v23 = vlaneseq }
   0x2   :  { %v68_v2 = vld [vmem:[%s2044_s1] sm:$0xff]  ;;  %47 = vrot.lane.b32.xlu0 %v43_v0, %s1736_s30  ;;  %v53_v3 = vrot.slane %v43_v0, 1  ;;  %v69_v4 = vld [vmem:[%s2044_s1 + $0x8] sm:$0xff]  ;;  %v64_v5 = vcombine.low %v43_v0, %v44_v1  ;;  %v54_v7 = vrot.slane %v44_v1, 1  ;;  %v159_v16 = vld [vmem:[%s2045_s2 + $0x18] sm:$0xff]  ;;  %1519 = vmatprep.mubr.msk.f32.mxu1 %vm1739_vm2, %v1740_v22  ;;  %vm167_vm3 = vcmask 1040384  }
   0x3   :  { %v1652_v6 = vpack.c.bf16 %v69_v4, %v68_v2  ;;  %v1657_v17 = vpack.c.bf16 %v159_v16, %v158_v15  ;;  %v156_v19 = vld [vmem:[%s2045_s2] sm:$0xff]  ;;  %v157_v20 = vld [vmem:[%s2045_s2 + $0x8] sm:$0xff]  ;;  %v1817_v24 = vshrl.u32 %v27_v23, 7  ;;  %v162_v37 = vld [vmem:[%s2045_s2 + $0x30] sm:$0xff]  ;;  %vm393_vm5 = vcmask 1046528  }
   0x4   :  { %55 = vrot.lane.b32.xlu1 %v53_v3, %s1737_s10  ;;  %1512 = vmatprep.mubr.msk.f32.mxu0 %vm74_vm0, %v64_v5  ;;  %v1660_v21 = vpack.c.bf16 %v157_v20, %v156_v19  ;;  %v1823_v26 = vld [vmem:[%s2046_s6] sm:$0x7]  ;;  %v161_v30 = vld [vmem:[%s2045_s2 + $0x28] sm:$0xff]  ;;  %v163_v38 = vld [vmem:[%s2045_s2 + $0x38] sm:$0xff]  ;;  %vm495_vm7 = vcmask 261120   ;;  %vm1413_vm8 = vcmask 31744  }
   0x5   :  { %1653 = vmatprep.subr.bf16.mxu0 %v1652_v6  ;;  %1658 = vmatpush3.bf16.msra.mxu1 %v1657_v17  ;;  %v72_v25 = vsub.s32 0, %v1817_v24  ;;  %v160_v29 = vld [vmem:[%s2045_s2 + $0x20] sm:$0xff]  ;;  %v33_v33 = vand.u32 3, %v1817_v24  ;;  %v1666_v43 = vpack.c.bf16 %v163_v38, %v162_v37  ;;  %v483_v50 = vld [vmem:[%s2047_s3 + $0x28] sm:$0xff]  ;;  %v484_v52 = vld [vmem:[%s2047_s3 + $0x30] sm:$0xff]  ;;  %v474_v63 = vsub.s32 1, %v1817_v24 }
   0x6   :  { %49 = vrot.lane.b32.xlu0 %v44_v1, %s1736_s30  ;;  %1655 = vmatpush3.bf16.msra.mxu0 %v1652_v6  ;;  %v1663_v36 = vpack.c.bf16 %v161_v30, %v160_v29  ;;  %v482_v49 = vld [vmem:[%s2047_s3 + $0x20] sm:$0xff]  ;;  %v485_v53 = vld [vmem:[%s2047_s3 + $0x38] sm:$0xff]  ;;  %v479_v56 = vld [vmem:[%s2047_s3 + $0x8] sm:$0xff]  ;;  %v721_v37 = vsub.s32 2, %v1817_v24 }
   0x7   :  { %1659 = vmatprep.subr.bf16.mxu0 %v1738_v18  ;;  %1662 = vmatprep.subr.bf16.mxu1 %v1738_v18  ;;  %v73_v27 = vrot.slane %v1823_v26, %v72_v25  ;;  %vm1839_vm4 = vcmp.ne.s32.totalorder %v33_v33, 0  ;;  %vm1852_vm6 = vcmp.ne.s32.totalorder %v33_v33, 3  ;;  %v1669_v51 = vpack.c.bf16 %v483_v50, %v482_v49  ;;  %v478_v55 = vld [vmem:[%s2047_s3] sm:$0xff]  ;;  %v480_v58 = vld [vmem:[%s2047_s3 + $0x10] sm:$0xff]  ;;  %v481_v59 = vld [vmem:[%s2047_s3 + $0x18] sm:$0xff] }
   0x8   :  { %57 = vrot.lane.b32.xlu1 %v54_v7, %s1737_s10  ;;  %v1672_v54 = vpack.c.bf16 %v485_v53, %v484_v52  ;;  %v1675_v57 = vpack.c.bf16 %v479_v56, %v478_v55  ;;  %v1678_v60 = vpack.c.bf16 %v481_v59, %v480_v58  ;;  %v475_v6 = vrot.slane %v1823_v26, %v474_v63  ;;  %v488_v15 = vld [vmem:[%s2047_s3 + $0x50] sm:$0xff]  ;;  %v489_v16 = vld [vmem:[%s2047_s3 + $0x58] sm:$0xff]  ;;  %v729_v29 = vld [vmem:[%s2048_s4 + $0x28] sm:$0xff] }
   0x9   :  { %v1684_v20 = vpack.c.bf16 %v489_v16, %v488_v15  ;;  %v726_v24 = vld [vmem:[%s2048_s4 + $0x10] sm:$0xff]  ;;  %v733_v55 = vld [vmem:[%s2048_s4 + $0x48] sm:$0xff]  ;;  %v735_v59 = vld [vmem:[%s2048_s4 + $0x58] sm:$0xff] }
   0xa   :  { %v734_v58 = vld [vmem:[%s2048_s4 + $0x50] sm:$0xff] }
  0x74   :  { %v48_v8 = vpop.permute.xlu0 %47 }
  0x76   :  { %v56_v9 = vpop.permute.xlu1 %55 }
  0x77   :  { %v62_v12 = vsel %vm61_vm1, %v48_v8, %v56_v9 }
  0x78   :  { %v50_v10 = vpop.permute.xlu0 %49 }
  0x7a   :  { %v58_v11 = vpop.permute.xlu1 %57 }
  0x7b   :  { %v63_v13 = vsel %vm61_vm1, %v50_v10, %v58_v11  ;;  %v486_v10 = vld [vmem:[%s2047_s3 + $0x40] sm:$0xff]  ;;  %v487_v11 = vld [vmem:[%s2047_s3 + $0x48] sm:$0xff] }
  0x7c   :  { %v67_v14 = vcombine.low %v62_v12, %v63_v13  ;;  %v1681_v13 = vpack.c.bf16 %v487_v11, %v486_v10 }
  0x7e   :  { %1513 = vmatmul.mubr.msk.f32.vlgmr.msra.gmra.mrb[0].mxu0 %vm74_vm0, %v67_v14 }
  0x7f   :  { %1526 = vmatprep.mubr.msk.f32.mxu0 %vm1739_vm2, %v1740_v22  ;;  %1661 = vmatpush3.bf16.msra.mxu0 %v1660_v21 }
  0x80   :  { %1665 = vmatprep.subr.bf16.mxu0 %v1738_v18 }
 0x151   :  { %v1514_v28 = vpop.f32.mrb[0].mxu0 }
 0x152   :  { %v151_v31 = vadd.f32 %v1514_v28, %v73_v27  ;;  %v145_v32 = vpop.f32.mrb[1].mxu0  ;;  %v728_v28 = vld [vmem:[%s2048_s4 + $0x20] sm:$0xff] }
 0x153   :  { %v146_v34 = vadd.f32 %v145_v32, %v73_v27  ;;  %v1687_v30 = vpack.c.bf16 %v729_v29, %v728_v28  ;;  %v731_v32 = vld [vmem:[%s2048_s4 + $0x38] sm:$0xff] }
 0x154   :  { %v155_v35 = vmax.f32 %v151_v31, 0.0  ;;  %v730_v31 = vld [vmem:[%s2048_s4 + $0x30] sm:$0xff] }
 0x155   :  { %v154_v39 = vmax.f32 %v146_v34, 0.0  ;;  %v1690_v33 = vpack.c.bf16 %v731_v32, %v730_v31  ;;  %v736_v34 = vld [vmem:[%s2049_s5] sm:$0xff] }
 0x156   :  { %v165_v40 = vrot.slane %v155_v35, 7 }
 0x157   :  { %v391_v42 = vrot.slane %v154_v39, 1  ;;  %1520 = vmatmul.mubr.msk.f32.vlgmr.msra.gmra.mrb[0].mxu1 %vm74_vm0, %v154_v39 }
 0x158   :  { %v168_v44 = vsel %vm167_vm3, 0.0, %v165_v40  ;;  %1664 = vmatpush3.bf16.msra.mxu1 %v1663_v36  ;;  %1533 = vmatprep.mubr.msk.f32.mxu1 %vm1739_vm2, %v1740_v22 }
 0x159   :  { %v171_v45 = vsel %vm1839_vm4, %v168_v44, 0.0  ;;  %1668 = vmatprep.subr.bf16.mxu1 %v1738_v18  ;;  %v394_v46 = vsel %vm393_vm5, %v391_v42, 0.0  ;;  %v722_v42 = vrot.slane %v1823_v26, %v721_v37  ;;  %v727_v26 = vld [vmem:[%s2048_s4 + $0x18] sm:$0xff] }
 0x15a   :  { %1527 = vmatmul.mubr.msk.f32.vlgmr.msra.gmra.mrb[2].mxu0 %vm74_vm0, %v171_v45  ;;  %v397_v48 = vsel %vm1852_vm6, %v394_v46, 0.0  ;;  %v724_v46 = vld [vmem:[%s2048_s4] sm:$0xff]  ;;  %v1696_v53 = vpack.c.bf16 %v727_v26, %v726_v24 }
 0x15b   :  { %1667 = vmatpush3.bf16.msra.mxu0 %v1666_v43  ;;  %1534 = vmatmul.mubr.msk.f32.vlgmr.msra.gmra.mrb[2].mxu1 %vm74_vm0, %v155_v35 }
 0x15c   :  { %1540 = vmatprep.mubr.msk.f32.mxu0 %vm1739_vm2, %v1740_v22  ;;  %1674 = vmatprep.subr.bf16.mxu0 %v1738_v18 }
 0x15d   :  { %1551 = vmatprep.mubr.msk.f32.mxu1 %vm1739_vm2, %v1740_v22  ;;  %1670 = vmatpush3.bf16.msra.mxu1 %v1669_v51 }
 0x15e   :  { %1541 = vmatmul.mubr.msk.f32.vlgmr.msra.gmra.mrb[4].mxu0 %vm74_vm0, %v397_v48  ;;  %1671 = vmatprep.subr.bf16.mxu1 %v1738_v18  ;;  %v725_v48 = vld [vmem:[%s2048_s4 + $0x8] sm:$0xff] }
 0x15f   :  { %1562 = vmatprep.mubr.msk.f32.mxu0 %vm1739_vm2, %v1740_v22  ;;  %1676 = vmatpush3.bf16.msra.mxu0 %v1675_v57  ;;  %v1693_v50 = vpack.c.bf16 %v725_v48, %v724_v46 }
 0x160   :  { %1677 = vmatprep.subr.bf16.mxu0 %v1738_v18 }
 0x161   :  { %1673 = vmatpush3.bf16.msra.mxu1 %v1672_v54  ;;  %v732_v54 = vld [vmem:[%s2048_s4 + $0x40] sm:$0xff] }
 0x162   :  { %1680 = vmatprep.subr.bf16.mxu1 %v1738_v18  ;;  %v1699_v57 = vpack.c.bf16 %v733_v55, %v732_v54 }
 0x163   :  { %1679 = vmatpush3.bf16.msra.mxu0 %v1678_v60 }
 0x164   :  { %1686 = vmatprep.subr.bf16.mxu0 %v1738_v18 }
 0x22a   :  { %v241_v61 = vpop.f32.mrb[0].mxu1 }
 0x22b   :  { %v1521_v62 = vpop.f32.mrb[1].mxu1 }
 0x22c   :  { %v1702_v62 = vpack.c.bf16 %v735_v59, %v734_v58 }
 0x22d   :  { %v314_v0 = vpop.f32.mrb[2].mxu0 }
 0x22e   :  { %v315_v1 = vadd.f32 %v314_v0, %v241_v61  ;;  %v1528_v2 = vpop.f32.mrb[3].mxu0  ;;  %v386_v3 = vpop.f32.mrb[2].mxu1 }
 0x22f   :  { %v1535_v4 = vpop.f32.mrb[3].mxu1 }
 0x230   :  { %v390_v5 = vadd.f32 %v386_v3, %v315_v1 }
 0x231   :  { %v467_v7 = vpop.f32.mrb[4].mxu0 }
 0x232   :  { %v471_v8 = vadd.f32 %v467_v7, %v390_v5  ;;  %v1542_v9 = vpop.f32.mrb[5].mxu0 }
 0x234   :  { %v476_v12 = vadd.f32 %v475_v6, %v471_v8 }
 0x236   :  { %v477_v14 = vmax.f32 %v476_v12, 0.0 }
 0x238   :  { %v491_v17 = vrot.slane %v477_v14, 7  ;;  %v641_v19 = vrot.slane %v477_v14, 1  ;;  %1552 = vmatmul.mubr.msk.f32.vlgmr.msra.gmra.mrb[4].mxu1 %vm495_vm7, %v477_v14 }
 0x239   :  { %1682 = vmatpush3.bf16.msra.mxu1 %v1681_v13  ;;  %1573 = vmatprep.mubr.msk.f32.mxu1 %vm1739_vm2, %v1740_v22 }
 0x23a   :  { %1683 = vmatprep.subr.bf16.mxu1 %v1738_v18  ;;  %v493_v21 = vsel %vm167_vm3, 0.0, %v491_v17  ;;  %v643_v25 = vsel %vm393_vm5, %v641_v19, 0.0 }
 0x23b   :  { %v494_v23 = vsel %vm1839_vm4, %v493_v21, 0.0  ;;  %v644_v27 = vsel %vm1852_vm6, %v643_v25, 0.0 }
 0x23c   :  { %1563 = vmatmul.mubr.msk.f32.vlgmr.msra.gmra.mrb[6].mxu0 %vm495_vm7, %v494_v23 }
 0x23d   :  { %1685 = vmatpush3.bf16.msra.mxu1 %v1684_v20  ;;  %1584 = vmatprep.mubr.msk.f32.mxu0 %vm1739_vm2, %v1740_v22 }
 0x23e   :  { %1609 = vmatprep.subr.mxu1 %v1740_v22  ;;  %1688 = vmatpush3.bf16.msra.mxu0 %v1687_v30 }
 0x23f   :  { %1689 = vmatprep.subr.bf16.mxu0 %v1738_v18 }
 0x240   :  { %1574 = vmatmul.mubr.msk.f32.vlgmr.msra.gmra.mrb[6].mxu1 %vm495_vm7, %v644_v27 }
 0x241   :  { %1611 = vmatprep.mubr.msk.f32.mxu1 %vm1739_vm2, %v1740_v22  ;;  %1610 = vmatpush3.msra.mxu1 %v736_v34 }
 0x242   :  { %1691 = vmatpush3.bf16.msra.mxu0 %v1690_v33  ;;  %1704 = vmatprep.subr.bf16.mxu1 %v1738_v18 }
 0x243   :  { %1692 = vmatprep.subr.bf16.mxu0 %v1738_v18 }
 0x30b   :  { %v564_v35 = vpop.f32.mrb[4].mxu1 }
 0x30c   :  { %v1553_v36 = vpop.f32.mrb[5].mxu1 }
 0x30f   :  { %v637_v38 = vpop.f32.mrb[6].mxu0 }
 0x310   :  { %v638_v39 = vadd.f32 %v637_v38, %v564_v35  ;;  %v1564_v40 = vpop.f32.mrb[7].mxu0 }
 0x313   :  { %v714_v43 = vpop.f32.mrb[6].mxu1 }
 0x314   :  { %v718_v44 = vadd.f32 %v714_v43, %v638_v39  ;;  %v1575_v45 = vpop.f32.mrb[7].mxu1 }
 0x316   :  { %v723_v49 = vadd.f32 %v722_v42, %v718_v44 }
 0x318   :  { %v737_v51 = vmax.f32 %v723_v49, 0.0 }
 0x31a   :  { %1585 = vmatmul.mubr.msk.f32.vlgmr.msra.gmra.mrb[8].mxu0 %vm495_vm7, %v737_v51  ;;  %v739_v52 = vrot.slane %v737_v51, 7  ;;  %v888_v61 = vrot.slane %v737_v51, 1 }
 0x31b   :  { %1694 = vmatpush3.bf16.msra.mxu0 %v1693_v50  ;;  %1595 = vmatprep.mubr.msk.f32.mxu0 %vm1739_vm2, %v1740_v22 }
 0x31c   :  { %1695 = vmatprep.subr.bf16.mxu0 %v1738_v18  ;;  %v741_v56 = vsel %vm167_vm3, 0.0, %v739_v52  ;;  %v890_v63 = vsel %vm393_vm5, %v888_v61, 0.0 }
 0x31d   :  { %v742_v60 = vsel %vm1839_vm4, %v741_v56, 0.0  ;;  %v891_v0 = vsel %vm1852_vm6, %v890_v63, 0.0 }
 0x31f   :  { %1697 = vmatpush3.bf16.msra.mxu0 %v1696_v53 }
 0x320   :  { %1698 = vmatprep.subr.bf16.mxu0 %v1738_v18 }
 0x322   :  { %1596 = vmatmul.mubr.msk.f32.vlgmr.msra.gmra.mrb[8].mxu0 %vm495_vm7, %v742_v60 }
 0x323   :  { %1700 = vmatpush3.bf16.msra.mxu0 %v1699_v57  ;;  %1606 = vmatprep.mubr.msk.f32.mxu0 %vm1739_vm2, %v1740_v22 }
 0x324   :  { %1701 = vmatprep.subr.bf16.mxu0 %v1738_v18 }
 0x327   :  { %1703 = vmatpush3.bf16.msra.mxu0 %v1702_v62 }
 0x328   :  { %1647 = vmatprep.subr.mxu0 %v1740_v22 }
 0x32a   :  { %1607 = vmatmul.mubr.msk.f32.vlgmr.msra.gmra.mrb[8].mxu0 %vm495_vm7, %v891_v0 }
 0x32b   :  { %1648 = vmatpush3.msra.mxu0 %v736_v34  ;;  %1649 = vmatprep.mubr.msk.f32.mxu0 %vm1739_vm2, %v1740_v22 }
 0x3fd   :  { %v961_v1 = vpop.f32.mrb[8].mxu0 }
 0x3fe   :  { %v966_v2 = vmax.f32 %v961_v1, 0.0  ;;  %v1608_v3 = vpop.f32.mrb[9].mxu0 }
 0x400   :  { %1612 = vmatmul.mubr.msk.f32.vlgmr.msra.gmra.mrb[8].mxu1 %vm61_vm1, %v966_v2 }
 0x401   :  { %1706 = vmatpush3.bf16.msra.mxu1 %v1687_v30  ;;  %1622 = vmatprep.mubr.msk.f32.mxu1 %vm1739_vm2, %v1740_v22 }
 0x402   :  { %1707 = vmatprep.subr.bf16.mxu1 %v1738_v18 }
 0x405   :  { %1709 = vmatpush3.bf16.msra.mxu1 %v1690_v33 }
 0x406   :  { %1710 = vmatprep.subr.bf16.mxu1 %v1738_v18 }
 0x4d3   :  { %v1036_v4 = vpop.f32.mrb[8].mxu1 }
 0x4d4   :  { %v1040_v5 = vadd.f32 %v1036_v4, %v723_v49  ;;  %v1613_v6 = vpop.f32.mrb[9].mxu1 }
 0x4d6   :  { %v1041_v7 = vmax.f32 %v1040_v5, 0.0 }
 0x4d8   :  { %v1043_v8 = vrot.slane %v1041_v7, 7  ;;  %1623 = vmatmul.mubr.msk.f32.vlgmr.msra.gmra.mrb[10].mxu1 %vm495_vm7, %v1041_v7  ;;  %v1192_v11 = vrot.slane %v1041_v7, 1 }
 0x4d9   :  { %1712 = vmatpush3.bf16.msra.mxu1 %v1693_v50  ;;  %1633 = vmatprep.mubr.msk.f32.mxu1 %vm1739_vm2, %v1740_v22 }
 0x4da   :  { %1713 = vmatprep.subr.bf16.mxu1 %v1738_v18  ;;  %v1045_v9 = vsel %vm167_vm3, 0.0, %v1043_v8  ;;  %v1194_v12 = vsel %vm393_vm5, %v1192_v11, 0.0 }
 0x4db   :  { %v1046_v10 = vsel %vm1839_vm4, %v1045_v9, 0.0  ;;  %v1195_v13 = vsel %vm1852_vm6, %v1194_v12, 0.0 }
 0x4dd   :  { %1715 = vmatpush3.bf16.msra.mxu1 %v1696_v53 }
 0x4de   :  { %1716 = vmatprep.subr.bf16.mxu1 %v1738_v18 }
 0x4e0   :  { %1634 = vmatmul.mubr.msk.f32.vlgmr.msra.gmra.mrb[10].mxu1 %vm495_vm7, %v1046_v10 }
 0x4e1   :  { %1718 = vmatpush3.bf16.msra.mxu1 %v1699_v57  ;;  %1644 = vmatprep.mubr.msk.f32.mxu1 %vm1739_vm2, %v1740_v22 }
 0x4e2   :  { %1719 = vmatprep.subr.bf16.mxu1 %v1738_v18 }
 0x4e5   :  { %1721 = vmatpush3.bf16.msra.mxu1 %v1702_v62 }
 0x4e8   :  { %1645 = vmatmul.mubr.msk.f32.vlgmr.msra.gmra.mrb[10].mxu1 %vm495_vm7, %v1195_v13 }
 0x5bb   :  { %v1265_v14 = vpop.f32.mrb[10].mxu1 }
 0x5bc   :  { %v1270_v41 = vmax.f32 %v1265_v14, 0.0  ;;  %v1646_v15 = vpop.f32.mrb[11].mxu1 }
 0x5be   :  { %1650 = vmatmul.mubr.msk.f32.vlgmr.msra.gmra.mrb[10].mxu0 %vm61_vm1, %v1270_v41 }
 0x691   :  { %v1340_v16 = vpop.f32.mrb[10].mxu0 }
 0x692   :  { %v1344_v17 = vadd.f32 %v1340_v16, %v1040_v5  ;;  %v1651_v19 = vpop.f32.mrb[11].mxu0 }
 0x694   :  { %v1345_v20 = vmax.f32 %v1344_v17, 0.0 }
 0x696   :  { %1349 = vxpose.xlu0.b32.start.end [1/1] (short) (narrow) %v1345_v20, 32  ;;  %v1347_v22 = vcombine.high %v1345_v20, %v1345_v20 }
 0x698   :  { %1381 = vxpose.xlu1.b32.start.end [1/1] (short) (narrow) %v1347_v22, 32 }
 0x716   :  { %v1365_v18 = vpop.trf.xlu0 }
 0x717   :  { %1414 = vst.msk [vmem:[%s2050_s7] sm:$0xff] %vm1413_vm8, %v1365_v18 }
 0x718   :  { %v1397_v47 = vpop.trf.xlu1 }
 0x719   :  { %1418 = vst.msk [vmem:[%s2050_s7 + $0x20] sm:$0xff] %vm1413_vm8, %v1397_v47 }
 0x71a   :  { %v1366_v21 = vpop.trf.xlu0 }
 0x71b   :  { %1415 = vst.msk [vmem:[%s2050_s7 + $0x8] sm:$0xff] %vm1413_vm8, %v1366_v21 }
 0x71c   :  { %v1398_v23 = vpop.trf.xlu1 }
 0x71d   :  { %1419 = vst.msk [vmem:[%s2050_s7 + $0x28] sm:$0xff] %vm1413_vm8, %v1398_v23 }
 0x71e   :  { %v1367_v25 = vpop.trf.xlu0 }
 0x71f   :  { %1416 = vst.msk [vmem:[%s2050_s7 + $0x10] sm:$0xff] %vm1413_vm8, %v1367_v25 }
 0x720   :  { %v1399_v27 = vpop.trf.xlu1 }
 0x721   :  { %1420 = vst.msk [vmem:[%s2050_s7 + $0x30] sm:$0xff] %vm1413_vm8, %v1399_v27 }
 0x722   :  { %v1368_v28 = vpop.trf.xlu0 }
 0x723   :  { %1417 = vst.msk [vmem:[%s2050_s7 + $0x18] sm:$0xff] %vm1413_vm8, %v1368_v28 }
 0x724   :  { %v1400_v29 = vpop.trf.xlu1 }
 0x725   :  { %1421 = vst.msk [vmem:[%s2050_s7 + $0x38] sm:$0xff] %vm1413_vm8, %v1400_v29 }

</bundles_post_ra>
